<compile_context>
chip_gen: v7x
topology: tpu7x:2x2x1
jax: 0.10.0
libtpu: 0.0.40
codegen_flags: <defaults>
</compile_context>

<pallas_src>
import functools

import jax
import jax.numpy as jnp
from jax import lax
from jax.experimental import pallas as pl
from jax.experimental.pallas import tpu as pltpu

EPS = 1e-5


def _round_up(x, m):
    return (x + m - 1) // m * m


def _conv_stats_kernel(x_ref, w_ref, conv_ref, stats_ref, acc_ref, *,
                       k, stride, T, Wo_pitch, q_win, Ho):
    """Pass 1: kw-packed shifted-matmul conv + per-block BN partial sums.

    x_ref:     (1, 1, R_in, KCin_pad)   windowed, kw-packed, height-grouped input rows
    w_ref:     (k, KCin_pad, TCO)       one (k*Cin, Cout-tile) slab per kh tap
    conv_ref:  (1, T, Wo_pitch, TCO)    conv output tile (compute_dtype)
    stats_ref: (1, 1, 2, TCO)           row 0 = sum, row 1 = sum of squares (valid rows)
    acc_ref:   (T*Wo_pitch, TCO) f32    VMEM accumulator scratch
    """
    rows = T * Wo_pitch
    for kh in range(k):
        base = ((kh % stride) * q_win + kh // stride) * Wo_pitch   # static, 8/16-aligned
        lhs = x_ref[0, 0, base:base + rows, :]
        part = jnp.dot(lhs, w_ref[kh], preferred_element_type=jnp.float32)
        if kh == 0:
            acc_ref[...] = part
        else:
            acc_ref[...] += part

    acc = acc_ref[...]
    tco = acc.shape[-1]
    acc3 = acc.reshape(T, Wo_pitch, tco)
    conv_ref[0] = acc3.astype(conv_ref.dtype)

    # BN partial sums.  Padded width columns are exactly zero (the packed input is
    # zero-padded there), so only rows past the valid output height need masking.
    n_valid = Ho - pl.program_id(1) * T
    ho_local = lax.broadcasted_iota(jnp.int32, (T, 1, 1), 0)
    masked = jnp.where(ho_local < n_valid, acc3, 0.0)
    s_ = jnp.sum(masked, axis=(0, 1), keepdims=True)          # (1, 1, tco)
    ss = jnp.sum(masked * acc3, axis=(0, 1), keepdims=True)
    stats_ref[0, 0] = jnp.concatenate([s_[0], ss[0]], axis=0)  # (2, tco)


def _bn_relu_kernel(conv_ref, scale_ref, shift_ref, out_ref, *, Wo):
    """Pass 2: y = relu(conv * scale + shift), width-cropped to Wo (f32 math)."""
    y = conv_ref[0].astype(jnp.float32) * scale_ref[...] + shift_ref[...]
    out_ref[0] = jnp.maximum(y[:, :Wo, :], 0.0).astype(out_ref.dtype)


def conv_bn_relu(x_nchw, weight, gamma=None, beta=None, conv_bias=None, *,
                 stride=1, compute_dtype=jnp.bfloat16, output_format="NCHW"):
    """Fused Conv2d(k, pad=(k-1)//2, stride) + BatchNorm2d(train) + ReLU.

    x_nchw: (N, Cin, H, W); weight: (Cout, Cin, k, k).
    with_bn=True  -> pass gamma/beta (conv has no bias).
    with_bn=False -> pass gamma=None and (optionally) conv_bias.
    compute_dtype: matmul-operand / conv-intermediate dtype (bf16 default for MXU rate;
    f32 matches PyTorch numerics).  Accumulation and BN/ReLU math are always f32.
    """
    N, Cin, H, W = x_nchw.shape
    Cout, Cin_w, k, k2 = weight.shape
    assert Cin_w == Cin and k == k2
    s = int(stride)
    pad = (k - 1) // 2
    Ho = (H + 2 * pad - k) // s + 1
    Wo = (W + 2 * pad - k) // s + 1

    comp_dt = jnp.dtype(compute_dtype)
    interm_dtype = compute_dtype               # bf16 intermediate halves pass-2 HBM bytes
    out_dtype = x_nchw.dtype

    KCin = k * Cin
    KCin_pad = _round_up(KCin, 16)             # sublane-friendly contraction width
    Cout_pad = _round_up(Cout, 128)
    tco = 256 if Cout_pad % 256 == 0 else 128  # fills v6e/v7x MXU N; v5e just splits it
    n_co = Cout_pad // tco

    w_align = 16 if comp_dt.itemsize < 4 else 8
    Wo_pitch = _round_up(Wo, w_align)          # aligned row pitch -> tap slices are views

    # Row tiling: ~1024 flattened rows per grid step bounds VMEM independent of H*W.
    T0 = max(1, 1024 // Wo_pitch)
    n_ho = -(-Ho // T0)
    T = -(-Ho // n_ho)
    Ho_pad = n_ho * T
    rows = T * Wo_pitch

    halo_q = (k - 1) // s
    q_win = T + halo_q
    R_in = s * q_win * Wo_pitch

    # ---- glue: kw-packed (width-strided), height-grouped, per-tile windowed input ----
    Q_tot = Ho_pad + halo_q
    H_grp = _round_up(max(s * Q_tot, H + 2 * pad), s)
    Q_grp = H_grp // s
    Wp = W + 2 * pad

    x_nhwc = jnp.transpose(x_nchw, (0, 2, 3, 1)).astype(compute_dtype)
    xp = jnp.pad(x_nhwc, ((0, 0), (pad, H_grp - H - pad), (pad, Wp - W - pad), (0, 0)))
    # pack the k kw-taps into channels (channel index = kw*Cin + cin), width stride applied
    xk = jnp.concatenate(
        [xp[:, :, kw:kw + (Wo - 1) * s + 1:s, :] for kw in range(k)], axis=-1)
    xk = jnp.pad(xk, ((0, 0), (0, 0), (0, Wo_pitch - Wo), (0, KCin_pad - KCin)))
    # group padded heights by residue mod stride so every kh tap is one contiguous slab
    xg = xk.reshape(N, Q_grp, s, Wo_pitch, KCin_pad).transpose(0, 2, 1, 3, 4)
    # per-row-tile windows (halo rows duplicated) so the kernel's input block is bounded
    xw = jnp.stack([xg[:, :, t * T:t * T + q_win] for t in range(n_ho)], axis=1)
    xw = xw.reshape(N, n_ho, R_in, KCin_pad)

    # weights: (Cout, Cin, kh, kw) -> (kh, kw*Cin, Cout), matching the packed channel order
    w = jnp.transpose(weight, (2, 3, 1, 0)).reshape(k, KCin, Cout)
    w = jnp.pad(w, ((0, 0), (0, KCin_pad - KCin), (0, Cout_pad - Cout))).astype(compute_dtype)

    grid = (N, n_ho, n_co)

    int_bytes = jnp.dtype(interm_dtype).itemsize
    vmem_est = (2 * R_in * KCin_pad * comp_dt.itemsize      # input window (double buffered)
                + 2 * k * KCin_pad * tco * comp_dt.itemsize  # weights
                + 2 * rows * tco * int_bytes                 # conv tile
                + 2 * 2 * tco * 4                            # stats tile
                + rows * tco * 4)                            # f32 accumulator scratch
    vmem_limit = int(min(64 * 2 ** 20, max(32 * 2 ** 20, 2 * vmem_est)))
    cparams = pltpu.CompilerParams(
        dimension_semantics=("parallel", "parallel", "parallel"),
        vmem_limit_bytes=vmem_limit)

    flops = 2 * N * n_ho * n_co * k * rows * KCin_pad * tco
    bytes_accessed = (xw.size * comp_dt.itemsize                     # input read once/(n,t)
                      + N * n_ho * w.size * comp_dt.itemsize         # weights per (n,t,j)
                      + N * Ho_pad * Wo_pitch * Cout_pad * int_bytes  # conv write
                      + N * n_ho * 2 * Cout_pad * 4)                  # stats write

    # ---------------- pass 1: conv + partial BN stats ----------------
    conv, stats = pl.pallas_call(
        functools.partial(_conv_stats_kernel, k=k, stride=s, T=T,
                          Wo_pitch=Wo_pitch, q_win=q_win, Ho=Ho),
        out_shape=(jax.ShapeDtypeStruct((N, Ho_pad, Wo_pitch, Cout_pad), interm_dtype),
                   jax.ShapeDtypeStruct((N, n_ho, 2, Cout_pad), jnp.float32)),
        grid=grid,
        in_specs=[
            pl.BlockSpec((1, 1, R_in, KCin_pad), lambda n, t, j: (n, t, 0, 0)),
            pl.BlockSpec((k, KCin_pad, tco), lambda n, t, j: (0, 0, j)),
        ],
        out_specs=(
            pl.BlockSpec((1, T, Wo_pitch, tco), lambda n, t, j: (n, t, 0, j)),
            pl.BlockSpec((1, 1, 2, tco), lambda n, t, j: (n, t, 0, j)),
        ),
        scratch_shapes=[pltpu.VMEM((rows, tco), jnp.float32)],
        compiler_params=cparams,
        cost_estimate=pl.CostEstimate(flops=flops, transcendentals=0,
                                      bytes_accessed=bytes_accessed),
    )(xw, w)

    # ---------------- tiny per-channel reduction (plain JAX) ----------------
    if gamma is not None:
        totals = jnp.sum(stats, axis=(0, 1))            # (2, Cout_pad)
        count = float(N * Ho * Wo)
        mean = totals[0] / count
        # TODO(synk): E[x^2]-E[x]^2 in f32 is cancellation-prone for very large N*H*W; a
        #             compensated/shifted variance would be more robust for huge batches.
        var = jnp.maximum(totals[1] / count - mean * mean, 0.0)   # biased (PyTorch train)
        inv_std = lax.rsqrt(var + EPS)
        gamma_p = jnp.pad(gamma.astype(jnp.float32), (0, Cout_pad - Cout))
        beta_p = jnp.pad(beta.astype(jnp.float32), (0, Cout_pad - Cout))
        scale = (gamma_p * inv_std).reshape(1, Cout_pad)
        shift = (beta_p - mean * gamma_p * inv_std).reshape(1, Cout_pad)
    else:
        # with_bn=False: Conv2d(bias=True) + ReLU  (scale=1, shift=bias)
        scale = jnp.ones((1, Cout_pad), jnp.float32)
        b = (jnp.zeros((Cout,), jnp.float32) if conv_bias is None
             else conv_bias.astype(jnp.float32))
        shift = jnp.pad(b, (0, Cout_pad - Cout)).reshape(1, Cout_pad)

    # ---------------- pass 2: y = relu(conv*scale + shift), width-cropped ----------------
    out4 = pl.pallas_call(
        functools.partial(_bn_relu_kernel, Wo=Wo),
        out_shape=jax.ShapeDtypeStruct((N, Ho_pad, Wo, Cout_pad), out_dtype),
        grid=grid,
        in_specs=[
            pl.BlockSpec((1, T, Wo_pitch, tco), lambda n, t, j: (n, t, 0, j)),
            pl.BlockSpec((1, tco), lambda n, t, j: (0, j)),
            pl.BlockSpec((1, tco), lambda n, t, j: (0, j)),
        ],
        out_specs=pl.BlockSpec((1, T, Wo, tco), lambda n, t, j: (n, t, 0, j)),
        compiler_params=cparams,
    )(conv, scale, shift)

    # ---- glue: trim padded output rows / channels, optional NCHW transpose ----
    out_nhwc = out4[:, :Ho, :, :Cout]
    if output_format == "NHWC":
        return out_nhwc
    return jnp.transpose(out_nhwc, (0, 3, 1, 2))


def _reference(x, weight, gamma, beta, *, stride=1):
    k = weight.shape[2]
    pad = (k - 1) // 2
    conv = lax.conv_general_dilated(
        x, weight, (stride, stride), ((pad, pad), (pad, pad)),
        dimension_numbers=("NCHW", "OIHW", "NCHW"))
    mean = jnp.mean(conv, axis=(0, 2, 3), keepdims=True)
    var = jnp.mean((conv - mean) ** 2, axis=(0, 2, 3), keepdims=True)
    bn = (conv - mean) * lax.rsqrt(var + EPS)
    bn = bn * gamma.reshape(1, -1, 1, 1) + beta.reshape(1, -1, 1, 1)
    return jnp.maximum(bn, 0.0)


def _reference_nobn(x, weight, bias, *, stride=1):
    k = weight.shape[2]
    pad = (k - 1) // 2
    conv = lax.conv_general_dilated(
        x, weight, (stride, stride), ((pad, pad), (pad, pad)),
        dimension_numbers=("NCHW", "OIHW", "NCHW"))
    return jnp.maximum(conv + bias.reshape(1, -1, 1, 1), 0.0)


if __name__ == "__main__":
    key = jax.random.PRNGKey(0)
    kx, kw_, kb = jax.random.split(key, 3)

    N, Cin, H, W = 2, 4, 16, 16
    Cout, k = 8, 3

    x = jax.random.normal(kx, (N, Cin, H, W), dtype=jnp.float32)
    fan_in = Cin * k * k
    bound = 1.0 / (fan_in ** 0.5)
    weight = jax.random.uniform(kw_, (Cout, Cin, k, k), dtype=jnp.float32,
                                minval=-bound, maxval=bound)
    gamma = jnp.ones((Cout,), dtype=jnp.float32)   # BatchNorm2d default init
    beta = jnp.zeros((Cout,), dtype=jnp.float32)

    # ---- with_bn=True, stride=1: f32 path (PyTorch-level numerics) ----
    ref = jax.block_until_ready(_reference(x, weight, gamma, beta, stride=1))
    out_f32 = jax.block_until_ready(
        conv_bn_relu(x, weight, gamma, beta, stride=1, compute_dtype=jnp.float32))
    assert out_f32.shape == (N, Cout, H, W)
    assert float(jnp.max(jnp.abs(out_f32 - ref))) < 2e-3

    # ---- with_bn=True, stride=1: default bf16 operands + bf16 intermediate ----
    out_bf16 = jax.block_until_ready(conv_bn_relu(x, weight, gamma, beta, stride=1))
    assert out_bf16.shape == (N, Cout, H, W)
    assert float(jnp.max(jnp.abs(out_bf16 - ref))) < 1e-1

    # ---- with_bn=True, stride=2 (strided outputs computed directly, no waste) ----
    ref_s2 = jax.block_until_ready(_reference(x, weight, gamma, beta, stride=2))
    out_s2 = jax.block_until_ready(
        conv_bn_relu(x, weight, gamma, beta, stride=2, compute_dtype=jnp.float32))
    assert out_s2.shape == ref_s2.shape
    assert float(jnp.max(jnp.abs(out_s2 - ref_s2))) < 2e-3

    # ---- with_bn=False: Conv2d(bias=True) + ReLU ----
    bias = 0.1 * jax.random.normal(kb, (Cout,), dtype=jnp.float32)
    ref_nb = jax.block_until_ready(_reference_nobn(x, weight, bias, stride=1))
    out_nb = jax.block_until_ready(
        conv_bn_relu(x, weight, conv_bias=bias, stride=1, compute_dtype=jnp.float32))
    assert out_nb.shape == ref_nb.shape
    assert float(jnp.max(jnp.abs(out_nb - ref_nb))) < 2e-3

    print("KERNEL_OK")
</pallas_src>

<mosaic_0001>
module attributes {stable_mosaic.version = 11 : i64} {
  func.func @_conv_stats_kernel(%arg0: i32, %arg1: i32, %arg2: i32, %arg3: memref<1x1x288x16xf32, #tpu.memory_space<vmem>>, %arg4: memref<3x16x128xf32, #tpu.memory_space<vmem>>, %arg5: memref<1x16x16x128xf32, #tpu.memory_space<vmem>>, %arg6: memref<1x1x2x128xf32, #tpu.memory_space<vmem>>, %arg7: memref<256x128xf32, #tpu.memory_space<vmem>>) attributes {dimension_semantics = [#tpu.dimension_semantics<parallel>, #tpu.dimension_semantics<parallel>, #tpu.dimension_semantics<parallel>], iteration_bounds = array<i64: 2, 1, 1>, scalar_prefetch = 0 : i64, scratch_operands = 1 : i64, tpu.core_type = #tpu.core_type<tc>, window_params = [{transform_indices = @transform_0, window_bounds = array<i64: 1, 1, 288, 16>}, {transform_indices = @transform_1, window_bounds = array<i64: 3, 16, 128>}, {transform_indices = @transform_2, window_bounds = array<i64: 1, 16, 16, 128>}, {transform_indices = @transform_3, window_bounds = array<i64: 1, 1, 2, 128>}]} {
    %c0 = arith.constant 0 : index
    %c0_0 = arith.constant 0 : index
    %c0_1 = arith.constant 0 : index
    %c0_2 = arith.constant 0 : index
    %0 = vector.load %arg3[%c0, %c0_0, %c0_1, %c0_2] : memref<1x1x288x16xf32, #tpu.memory_space<vmem>>, vector<1x1x256x16xf32>
    %1 = vector.shape_cast %0 : vector<1x1x256x16xf32> to vector<256x16xf32>
    %c0_3 = arith.constant 0 : index
    %c0_4 = arith.constant 0 : index
    %c0_5 = arith.constant 0 : index
    %2 = vector.load %arg4[%c0_3, %c0_4, %c0_5] : memref<3x16x128xf32, #tpu.memory_space<vmem>>, vector<1x16x128xf32>
    %3 = vector.shape_cast %2 : vector<1x16x128xf32> to vector<16x128xf32>
    %cst = arith.constant dense<0.000000e+00> : vector<256x128xf32>
    %4 = tpu.matmul %1, %3, %cst {dimension_numbers = #tpu.dot_dimension_numbers<[1], [0], [0], [1], [0, 0, 1, 1], [], []>} : vector<256x16xf32>, vector<16x128xf32>, vector<256x128xf32> -> vector<256x128xf32>
    %c0_6 = arith.constant 0 : index
    %c0_7 = arith.constant 0 : index
    %5 = vector.load %arg7[%c0_6, %c0_7] : memref<256x128xf32, #tpu.memory_space<vmem>>, vector<256x128xf32>
    tpu.vector_store %arg7[%c0_6, %c0_7], %4 {strides = array<i32>} : memref<256x128xf32, #tpu.memory_space<vmem>>, vector<256x128xf32>,
    %c0_8 = arith.constant 0 : index
    %c0_9 = arith.constant 0 : index
    %c16 = arith.constant 16 : index
    %c0_10 = arith.constant 0 : index
    %6 = vector.load %arg3[%c0_8, %c0_9, %c16, %c0_10] : memref<1x1x288x16xf32, #tpu.memory_space<vmem>>, vector<1x1x256x16xf32>
    %7 = vector.shape_cast %6 : vector<1x1x256x16xf32> to vector<256x16xf32>
    %c1 = arith.constant 1 : index
    %c0_11 = arith.constant 0 : index
    %c0_12 = arith.constant 0 : index
    %8 = vector.load %arg4[%c1, %c0_11, %c0_12] : memref<3x16x128xf32, #tpu.memory_space<vmem>>, vector<1x16x128xf32>
    %9 = vector.shape_cast %8 : vector<1x16x128xf32> to vector<16x128xf32>
    %cst_13 = arith.constant dense<0.000000e+00> : vector<256x128xf32>
    %10 = tpu.matmul %7, %9, %cst_13 {dimension_numbers = #tpu.dot_dimension_numbers<[1], [0], [0], [1], [0, 0, 1, 1], [], []>} : vector<256x16xf32>, vector<16x128xf32>, vector<256x128xf32> -> vector<256x128xf32>
    %c0_14 = arith.constant 0 : index
    %c0_15 = arith.constant 0 : index
    %11 = vector.load %arg7[%c0_14, %c0_15] : memref<256x128xf32, #tpu.memory_space<vmem>>, vector<256x128xf32>
    %12 = arith.addf %11, %10 : vector<256x128xf32>
    %c0_16 = arith.constant 0 : index
    %c0_17 = arith.constant 0 : index
    %13 = vector.load %arg7[%c0_16, %c0_17] : memref<256x128xf32, #tpu.memory_space<vmem>>, vector<256x128xf32>
    tpu.vector_store %arg7[%c0_16, %c0_17], %12 {strides = array<i32>} : memref<256x128xf32, #tpu.memory_space<vmem>>, vector<256x128xf32>,
    %c0_18 = arith.constant 0 : index
    %c0_19 = arith.constant 0 : index
    %c32 = arith.constant 32 : index
    %c0_20 = arith.constant 0 : index
    %14 = vector.load %arg3[%c0_18, %c0_19, %c32, %c0_20] : memref<1x1x288x16xf32, #tpu.memory_space<vmem>>, vector<1x1x256x16xf32>
    %15 = vector.shape_cast %14 : vector<1x1x256x16xf32> to vector<256x16xf32>
    %c2 = arith.constant 2 : index
    %c0_21 = arith.constant 0 : index
    %c0_22 = arith.constant 0 : index
    %16 = vector.load %arg4[%c2, %c0_21, %c0_22] : memref<3x16x128xf32, #tpu.memory_space<vmem>>, vector<1x16x128xf32>
    %17 = vector.shape_cast %16 : vector<1x16x128xf32> to vector<16x128xf32>
    %cst_23 = arith.constant dense<0.000000e+00> : vector<256x128xf32>
    %18 = tpu.matmul %15, %17, %cst_23 {dimension_numbers = #tpu.dot_dimension_numbers<[1], [0], [0], [1], [0, 0, 1, 1], [], []>} : vector<256x16xf32>, vector<16x128xf32>, vector<256x128xf32> -> vector<256x128xf32>
    %c0_24 = arith.constant 0 : index
    %c0_25 = arith.constant 0 : index
    %19 = vector.load %arg7[%c0_24, %c0_25] : memref<256x128xf32, #tpu.memory_space<vmem>>, vector<256x128xf32>
    %20 = arith.addf %19, %18 : vector<256x128xf32>
    %c0_26 = arith.constant 0 : index
    %c0_27 = arith.constant 0 : index
    %21 = vector.load %arg7[%c0_26, %c0_27] : memref<256x128xf32, #tpu.memory_space<vmem>>, vector<256x128xf32>
    tpu.vector_store %arg7[%c0_26, %c0_27], %20 {strides = array<i32>} : memref<256x128xf32, #tpu.memory_space<vmem>>, vector<256x128xf32>,
    %c0_28 = arith.constant 0 : index
    %c0_29 = arith.constant 0 : index
    %22 = vector.load %arg7[%c0_28, %c0_29] : memref<256x128xf32, #tpu.memory_space<vmem>>, vector<256x128xf32>
    %23 = vector.shape_cast %22 : vector<256x128xf32> to vector<16x16x128xf32>
    %c0_30 = arith.constant 0 : index
    %c0_31 = arith.constant 0 : index
    %c0_32 = arith.constant 0 : index
    %c0_33 = arith.constant 0 : index
    %24 = vector.load %arg5[%c0_30, %c0_31, %c0_32, %c0_33] : memref<1x16x16x128xf32, #tpu.memory_space<vmem>>, vector<1x16x16x128xf32>
    %25 = vector.shape_cast %24 : vector<1x16x16x128xf32> to vector<16x16x128xf32>
    %26 = vector.shape_cast %23 : vector<16x16x128xf32> to vector<1x16x16x128xf32>
    tpu.vector_store %arg5[%c0_30, %c0_31, %c0_32, %c0_33], %26 {strides = array<i32>} : memref<1x16x16x128xf32, #tpu.memory_space<vmem>>, vector<1x16x16x128xf32>,
    %c16_i32 = arith.constant 16 : i32
    %27 = arith.muli %arg1, %c16_i32 : i32
    %c16_i32_34 = arith.constant 16 : i32
    %28 = arith.subi %c16_i32_34, %27 : i32
    %29 = tpu.iota {dimensions = array<i32: 0>} : vector<16x1x1xi32>
    %30 = vector.broadcast %28 : i32 to vector<16x1x1xi32>
    %31 = arith.cmpi slt, %29, %30 : vector<16x1x1xi32>
    %cst_35 = arith.constant 0.000000e+00 : f32
    %32 = vector.shape_cast %31 : vector<16x1x1xi1> to vector<16x1x1xi1>
    %33 = vector.broadcast %32 : vector<16x1x1xi1> to vector<16x16x128xi1>
    %34 = vector.broadcast %cst_35 : f32 to vector<16x16x128xf32>
    %35 = arith.select %33, %23, %34 : vector<16x16x128xi1>, vector<16x16x128xf32>
    %cst_36 = arith.constant dense<0.000000e+00> : vector<128xf32>
    %36 = vector.multi_reduction <add>, %35, %cst_36 [0, 1] : vector<16x16x128xf32> to vector<128xf32>
    %37 = vector.shape_cast %36 : vector<128xf32> to vector<1x1x128xf32>
    %38 = arith.mulf %35, %23 : vector<16x16x128xf32>
    %cst_37 = arith.constant dense<0.000000e+00> : vector<128xf32>
    %39 = vector.multi_reduction <add>, %38, %cst_37 [0, 1] : vector<16x16x128xf32> to vector<128xf32>
    %40 = vector.shape_cast %39 : vector<128xf32> to vector<1x1x128xf32>
    %41 = vector.shape_cast %37 : vector<1x1x128xf32> to vector<1x128xf32>
    %42 = vector.shape_cast %40 : vector<1x1x128xf32> to vector<1x128xf32>
    %43 = tpu.concatenate %41, %42 in 0 : vector<1x128xf32>, vector<1x128xf32> -> vector<2x128xf32>
    %c0_38 = arith.constant 0 : index
    %c0_39 = arith.constant 0 : index
    %c0_40 = arith.constant 0 : index
    %c0_41 = arith.constant 0 : index
    %44 = vector.load %arg6[%c0_38, %c0_39, %c0_40, %c0_41] : memref<1x1x2x128xf32, #tpu.memory_space<vmem>>, vector<1x1x2x128xf32>
    %45 = vector.shape_cast %44 : vector<1x1x2x128xf32> to vector<2x128xf32>
    %46 = vector.shape_cast %43 : vector<2x128xf32> to vector<1x1x2x128xf32>
    tpu.vector_store %arg6[%c0_38, %c0_39, %c0_40, %c0_41], %46 {strides = array<i32>} : memref<1x1x2x128xf32, #tpu.memory_space<vmem>>, vector<1x1x2x128xf32>,
    return
  }
  func.func @transform_0(%arg0: i32, %arg1: i32, %arg2: i32) -> (i32, i32, i32, i32) {
    %c0_i32 = arith.constant 0 : i32
    %c0_i32_0 = arith.constant 0 : i32
    %c0_i32_1 = arith.constant 0 : i32
    return %arg0, %arg1, %c0_i32, %c0_i32_0 : i32, i32, i32, i32
  }
  func.func @transform_1(%arg0: i32, %arg1: i32, %arg2: i32) -> (i32, i32, i32) {
    %c0_i32 = arith.constant 0 : i32
    %c0_i32_0 = arith.constant 0 : i32
    %c0_i32_1 = arith.constant 0 : i32
    return %c0_i32, %c0_i32_0, %arg2 : i32, i32, i32
  }
  func.func @transform_2(%arg0: i32, %arg1: i32, %arg2: i32) -> (i32, i32, i32, i32) {
    %c0_i32 = arith.constant 0 : i32
    %c0_i32_0 = arith.constant 0 : i32
    return %arg0, %arg1, %c0_i32, %arg2 : i32, i32, i32, i32
  }
  func.func @transform_3(%arg0: i32, %arg1: i32, %arg2: i32) -> (i32, i32, i32, i32) {
    %c0_i32 = arith.constant 0 : i32
    %c0_i32_0 = arith.constant 0 : i32
    return %arg0, %arg1, %c0_i32, %arg2 : i32, i32, i32, i32
  }
}

</mosaic_0001>

<bundles_post_ra>
// kernel: tpu_custom_call.1
= control target key start
LH: loop header
LB: loop body
LE: loop exit
PB: predicated region body
PF: predicated region fallthrough
CT: control target
= control target key end

     0   :  { %9 = vsyncpa [#allocation4], 0  ;;  %s2966_s0 = inlined_call_operand.vmem [shape: f32[2,1,288,16], index: 0, kind: input, shape index: {}]   ;;  %s2967_s1 = inlined_call_operand.vmem [shape: f32[3,16,128], index: 1, kind: input, shape index: {}]   ;;  %s2968_s2 = inlined_call_operand.hbm [shape: f32[2,16,16,128], index: 2, kind: output, shape index: {0}]   ;;  %s2969_s3 = inlined_call_operand.hbm [shape: f32[2,1,2,128], index: 3, kind: output, shape index: {1}]  }
   0x1   :  { %11 = vsyncpa [#allocation4 + $0x1], 0 }
   0x2   :  { %12 = vsyncpa [#allocation6], 0 }
   0x3   :  { %14 = vsyncpa [#allocation6 + $0x1], 0  ;;  %s2612_s12 = smov 0   ;;  %s2614_s13 = smov 0  }
   0x4   :  { %s2616_s14 = smov 0   ;;  %s2618_s15 = smov 0  }
   0x5   :  { %s2620_s16 = smov 0   ;;  %s2622_s17 = smov 0  }
   0x6 LB: > { %s1960_s18 = sadd.s32 4294967295, %s2586_s17   ;;  %s1961_s19 = sadd.s32 4294967294, %s2586_s17   ;;  %s2586_s17 = sphi %s2622_s17, %s20_s17   ;;  %s2582_s16 = sphi %s2620_s16, %s2976_s16   ;;  %s2578_s15 = sphi %s2618_s15, %s2975_s15   ;;  %s2574_s14 = sphi %s2616_s14, %s2974_s14   ;;  %s2570_s13 = sphi %s2614_s13, %s2973_s13   ;;  %s2566_s12 = sphi %s2612_s12, %s2972_s12  }
   0x7   : > { %s39_s20 = sadd.s32 1, %s2582_s16  ;;  %s104_s21 = sadd.s32 1, %s2574_s14 }
   0x8   : > { %p41_p0 = scmp.ge.s32.totalorder %s39_s20, 2  ;;  %p114_p1 = scmp.ne.s32.totalorder %s2574_s14, %s2570_s13 }
   0x9   : > { %p115_p2 = scmp.eq.s32.totalorder %s1960_s18, 1  ;;  %p120_p3 = scmp.ne.s32.totalorder %s2570_s13, %s2566_s12 }
   0xa   : > { %s2978_s20 = smov (%p41_p0, %s39_s20), 0  ;;  %p121_p5 = scmp.eq.s32.totalorder %s1961_s19, 1 }
   0xb   : > { %p2652_p4 = por %p115_p2, %p114_p1  ;;  %s97_s23 = ssub.s32 %s2582_s16, %s2978_s20 }
   0xc   : > { %p1965_p6 = scmp.ge.s32.totalorder %s2586_s17, 1  ;;  %p102_p7 = scmp.eq.s32.totalorder %s97_s23, 0 }
   0xd   : > { %p2659_p8 = por %p121_p5, %p120_p3  ;;  %p188_p9 = scmp.lt.s32.totalorder %s2586_s17, 3 }
   0xe   : > { %s2665_s25 = scalar_select %p102_p7, %s2574_s14, %s104_s21  }
   0xf   : > { %p189_p10 = pnand %p1965_p6, %p188_p9 }
  0x10   : > { %v271_v0 = vld [vmem:[%s2967_s1] sm:$0xff] (!%p189_p10)  ;;  %v272_v1 = vld [vmem:[%s2967_s1 + $0x8] sm:$0xff] (!%p189_p10)  ;;  %v2001_v2 = vld [vmem:[%s2967_s1 + $0x10] sm:$0xff] (!%p189_p10)  ;;  %p225_p11 = scmp.lt.s32.totalorder (!%p189_p10), %s2578_s15, 1  ;;  %vm273_vm0 = vcmask (!%p189_p10), 130048   ;;  %s2833_s26 = sand.u32 (!%p189_p10), 1, %s2570_s13  }
  0x11   : > { %192 = sbr.rel (%p189_p10) target bundleno = 382 (0x17e), region = 28  ;;  %v2335_v3 = vpack.c.bf16 (!%p189_p10), %v272_v1, %v271_v0  ;;  %v2002_v4 = vld [vmem:[%s2967_s1 + $0x18] sm:$0xff] (!%p189_p10)  ;;  %v2035_v5 = vld [vmem:[%s2967_s1 + $0x20] sm:$0xff] (!%p189_p10)  ;;  %v2036_v6 = vld [vmem:[%s2967_s1 + $0x28] sm:$0xff] (!%p189_p10)  ;;  %s1966_s27 = sshll.u32 (!%p189_p10), %s2833_s26, 8 }
  0x12   : > { %v2339_v7 = vpack.c.bf16 (!%p189_p10), %v2002_v4, %v2001_v2  ;;  %v2343_v8 = vpack.c.bf16 (!%p189_p10), %v2036_v6, %v2035_v5  ;;  %s2840_s28 = scalar_lea.vmem (!%p189_p10), [#allocation3], %s1966_s27  ;;  %s2076_s29 = sshll.u32 (!%p189_p10), %s2578_s15, 12 }
  0x13   : > { %2336 = vmatprep.subr.bf16.mxu1 (!%p189_p10), %v2335_v3  ;;  %s1810_s30 = sshll.u32 (!%p189_p10), %s2840_s28, 4  ;;  %s2883_s6 = scalar_lea.hbm (!%p189_p10), %s2968_s2, %s2076_s29  ;;  %s2885_s30 = int_to_ptr.vmem [resolvable:$true] %s1810_s30 }
  0x14   : > { %2340 = vmatprep.subr.bf16.mxu0 (!%p189_p10), %v2339_v7  ;;  %2338 = vmatpush3.bf16.msra.mxu1 (!%p189_p10), %v2335_v3  ;;  %s1788_s7 = scalar_lea.sflag (!%p189_p10), [#allocation4], %s2833_s26  ;;  %s2476_s8 = scalar_lea.vmem (!%p189_p10), %s2885_s30, 4096 }
  0x15   : > { %2342 = vmatpush3.bf16.msra.mxu0 (!%p189_p10), %v2339_v7  ;;  %2347 = vmatprep.subr.bf16.mxu1 (!%p189_p10), %v2339_v7  ;;  %p2477_p12 = scmp.ne.s32.totalorder (!%p189_p10), %s2885_s30, %s2476_s8  ;;  %s2588_s9 = smov (!%p189_p10), [#allocation3]  }
  0x16   : > { %2344 = vmatprep.subr.bf16.mxu0 (!%p189_p10), %v2343_v8  ;;  %s2480_s10 = sshll.u32 (!%p189_p10), %s2588_s9, 4  ;;  %s2481_s10 = int_to_ptr.vmem [resolvable:$false] %s2480_s10 }
  0x17   : > { %p2478_p13 = pnand (!%p189_p10), %p2477_p12, %p2652_p4  ;;  %p2483_p1 = scmp.lt.s32.totalorder (!%p189_p10), %s2885_s30, %s2481_s10 }
  0x18   : > { %s226_s11 = scalar_select %p225_p11, %s2578_s15, 1 }
  0x19   : > { %p2479_p0 = pneg %p2478_p13 }
  0x1a   : > { %s2413_s18 = smul.u32 288, %s226_s11  ;;  %s2482_s11 = scalar_lea.vmem %s2481_s10, 8192 }
  0x1b   : > { %p2484_p2 = scmp.lt.s32.totalorder %s2482_s11, %s2476_s8 }
  0x1c   : > { %s2690_s23 = scalar_lea.vmem %s2966_s0, %s2413_s18 }
  0x1d   : > { %v239_v9 = vld [vmem:[%s2690_s23] sm:$0xff]  ;;  %v627_v10 = vld [vmem:[%s2690_s23 + $0x10] sm:$0xff]  ;;  %v240_v11 = vld [vmem:[%s2690_s23 + $0x8] sm:$0xff]  ;;  %p2485_p3 = por %p2484_p2, %p2483_p1 }
  0x1e   : > { %2183 = vmatprep.mubr.msk.f32.mxu1 %vm273_vm0, %v239_v9  ;;  %2235 = vmatprep.mubr.msk.f32.mxu0 %vm273_vm0, %v627_v10  ;;  %v628_v12 = vld [vmem:[%s2690_s23 + $0x18] sm:$0xff]  ;;  %v629_v13 = vld [vmem:[%s2690_s23 + $0x20] sm:$0xff]  ;;  %v630_v14 = vld [vmem:[%s2690_s23 + $0x28] sm:$0xff] }
  0x1f   : > { %2184 = vmatmul.mubr.msk.f32.vlgmr.msra.gmra.mrb[0].mxu1 %vm273_vm0, %v240_v11  ;;  %2236 = vmatmul.mubr.msk.f32.vlgmr.msra.gmra.mrb[0].mxu0 %vm273_vm0, %v628_v12  ;;  %v631_v15 = vld [vmem:[%s2690_s23 + $0x30] sm:$0xff]  ;;  %v632_v16 = vld [vmem:[%s2690_s23 + $0x38] sm:$0xff]  ;;  %v633_v17 = vld [vmem:[%s2690_s23 + $0x40] sm:$0xff]  ;;  %p2486_p5 = pnand %p2485_p3, %p2479_p0 }
  0x20   : > { %2348 = vmatpush3.bf16.msra.mxu1 %v2339_v7  ;;  %2346 = vmatpush3.bf16.msra.mxu0 %v2343_v8  ;;  %v634_v18 = vld [vmem:[%s2690_s23 + $0x48] sm:$0xff]  ;;  %v635_v19 = vld [vmem:[%s2690_s23 + $0x50] sm:$0xff]  ;;  %v636_v20 = vld [vmem:[%s2690_s23 + $0x58] sm:$0xff] }
  0x21   : > { %2186 = vmatprep.mubr.msk.f32.mxu1 %vm273_vm0, %v627_v10  ;;  %2238 = vmatprep.mubr.msk.f32.mxu0 %vm273_vm0, %v629_v13  ;;  %v637_v21 = vld [vmem:[%s2690_s23 + $0x60] sm:$0xff]  ;;  %v638_v22 = vld [vmem:[%s2690_s23 + $0x68] sm:$0xff]  ;;  %v639_v23 = vld [vmem:[%s2690_s23 + $0x70] sm:$0xff] }
  0x22   : > { %v640_v24 = vld [vmem:[%s2690_s23 + $0x78] sm:$0xff]  ;;  %v641_v25 = vld [vmem:[%s2690_s23 + $0x80] sm:$0xff]  ;;  %v642_v26 = vld [vmem:[%s2690_s23 + $0x88] sm:$0xff] }
  0x23   : > { %2187 = vmatmul.mubr.msk.f32.gmra.mrb[2].mxu1 %vm273_vm0, %v628_v12  ;;  %2239 = vmatmul.mubr.msk.f32.gmra.mrb[2].mxu0 %vm273_vm0, %v630_v14  ;;  %v257_v27 = vld [vmem:[%s2690_s23 + $0x90] sm:$0xff]  ;;  %v258_v28 = vld [vmem:[%s2690_s23 + $0x98] sm:$0xff]  ;;  %v259_v29 = vld [vmem:[%s2690_s23 + $0xa0] sm:$0xff] }
  0x24   : > { %2189 = vmatprep.mubr.msk.f32.mxu1 %vm273_vm0, %v629_v13  ;;  %2241 = vmatprep.mubr.msk.f32.mxu0 %vm273_vm0, %v631_v15  ;;  %v260_v30 = vld [vmem:[%s2690_s23 + $0xa8] sm:$0xff]  ;;  %v261_v31 = vld [vmem:[%s2690_s23 + $0xb0] sm:$0xff]  ;;  %v262_v32 = vld [vmem:[%s2690_s23 + $0xb8] sm:$0xff] }
  0x25   : > { %v263_v33 = vld [vmem:[%s2690_s23 + $0xc0] sm:$0xff]  ;;  %v264_v34 = vld [vmem:[%s2690_s23 + $0xc8] sm:$0xff]  ;;  %v265_v35 = vld [vmem:[%s2690_s23 + $0xd0] sm:$0xff] }
  0x26   : > { %v266_v36 = vld [vmem:[%s2690_s23 + $0xd8] sm:$0xff]  ;;  %v267_v37 = vld [vmem:[%s2690_s23 + $0xe0] sm:$0xff]  ;;  %v268_v38 = vld [vmem:[%s2690_s23 + $0xe8] sm:$0xff] }
  0x27   : > { %2190 = vmatmul.mubr.msk.f32.gmra.mrb[4].mxu1 %vm273_vm0, %v630_v14  ;;  %2242 = vmatmul.mubr.msk.f32.gmra.mrb[4].mxu0 %vm273_vm0, %v632_v16  ;;  %v269_v39 = vld [vmem:[%s2690_s23 + $0xf0] sm:$0xff]  ;;  %v270_v40 = vld [vmem:[%s2690_s23 + $0xf8] sm:$0xff]  ;;  %v1107_v41 = vld [vmem:[%s2690_s23 + $0x100] sm:$0xff] }
  0x28   : > { %2192 = vmatprep.mubr.msk.f32.mxu1 %vm273_vm0, %v631_v15  ;;  %2244 = vmatprep.mubr.msk.f32.mxu0 %vm273_vm0, %v633_v17  ;;  %v1108_v42 = vld [vmem:[%s2690_s23 + $0x108] sm:$0xff]  ;;  %v1109_v43 = vld [vmem:[%s2690_s23 + $0x110] sm:$0xff]  ;;  %v1110_v44 = vld [vmem:[%s2690_s23 + $0x118] sm:$0xff] }
  0x2b   : > { %2193 = vmatmul.mubr.msk.f32.gmra.mrb[6].mxu1 %vm273_vm0, %v632_v16  ;;  %2245 = vmatmul.mubr.msk.f32.gmra.mrb[6].mxu0 %vm273_vm0, %v634_v18 }
  0x2c   : > { %2195 = vmatprep.mubr.msk.f32.mxu1 %vm273_vm0, %v633_v17  ;;  %2247 = vmatprep.mubr.msk.f32.mxu0 %vm273_vm0, %v635_v19 }
  0x2f   : > { %2196 = vmatmul.mubr.msk.f32.gmra.mrb[8].mxu1 %vm273_vm0, %v634_v18  ;;  %2248 = vmatmul.mubr.msk.f32.gmra.mrb[8].mxu0 %vm273_vm0, %v636_v20 }
  0x30   : > { %2198 = vmatprep.mubr.msk.f32.mxu1 %vm273_vm0, %v635_v19  ;;  %2250 = vmatprep.mubr.msk.f32.mxu0 %vm273_vm0, %v637_v21 }
  0x33   : > { %2199 = vmatmul.mubr.msk.f32.gmra.mrb[10].mxu1 %vm273_vm0, %v636_v20  ;;  %2251 = vmatmul.mubr.msk.f32.gmra.mrb[10].mxu0 %vm273_vm0, %v638_v22 }
  0x34   : > { %2201 = vmatprep.mubr.msk.f32.mxu1 %vm273_vm0, %v637_v21  ;;  %2253 = vmatprep.mubr.msk.f32.mxu0 %vm273_vm0, %v639_v23 }
  0x37   : > { %2202 = vmatmul.mubr.msk.f32.gmra.mrb[12].mxu1 %vm273_vm0, %v638_v22  ;;  %2254 = vmatmul.mubr.msk.f32.gmra.mrb[12].mxu0 %vm273_vm0, %v640_v24 }
  0x38   : > { %2204 = vmatprep.mubr.msk.f32.mxu1 %vm273_vm0, %v639_v23  ;;  %2256 = vmatprep.mubr.msk.f32.mxu0 %vm273_vm0, %v641_v25 }
  0x3b   : > { %2205 = vmatmul.mubr.msk.f32.gmra.mrb[14].mxu1 %vm273_vm0, %v640_v24  ;;  %2257 = vmatmul.mubr.msk.f32.gmra.mrb[14].mxu0 %vm273_vm0, %v642_v26 }
  0x3c   : > { %2207 = vmatprep.mubr.msk.f32.mxu1 %vm273_vm0, %v641_v25  ;;  %2287 = vmatprep.mubr.msk.f32.mxu0 %vm273_vm0, %v629_v13 }
  0x3f   : > { %2208 = vmatmul.mubr.msk.f32.gmra.mrb[16].mxu1 %vm273_vm0, %v642_v26  ;;  %2288 = vmatmul.mubr.msk.f32.vlgmr.msra.gmra.mrb[0].mxu0 %vm273_vm0, %v630_v14 }
  0x40   : > { %2210 = vmatprep.mubr.msk.f32.mxu1 %vm273_vm0, %v257_v27  ;;  %2290 = vmatprep.mubr.msk.f32.mxu0 %vm273_vm0, %v631_v15 }
  0x43   : > { %2211 = vmatmul.mubr.msk.f32.gmra.mrb[18].mxu1 %vm273_vm0, %v258_v28  ;;  %2291 = vmatmul.mubr.msk.f32.gmra.mrb[2].mxu0 %vm273_vm0, %v632_v16 }
  0x44   : > { %2213 = vmatprep.mubr.msk.f32.mxu1 %vm273_vm0, %v259_v29  ;;  %2293 = vmatprep.mubr.msk.f32.mxu0 %vm273_vm0, %v633_v17 }
  0x47   : > { %2214 = vmatmul.mubr.msk.f32.gmra.mrb[20].mxu1 %vm273_vm0, %v260_v30  ;;  %2294 = vmatmul.mubr.msk.f32.gmra.mrb[4].mxu0 %vm273_vm0, %v634_v18 }
  0x48   : > { %2216 = vmatprep.mubr.msk.f32.mxu1 %vm273_vm0, %v261_v31  ;;  %2296 = vmatprep.mubr.msk.f32.mxu0 %vm273_vm0, %v635_v19 }
  0x4b   : > { %2217 = vmatmul.mubr.msk.f32.gmra.mrb[22].mxu1 %vm273_vm0, %v262_v32  ;;  %2297 = vmatmul.mubr.msk.f32.gmra.mrb[6].mxu0 %vm273_vm0, %v636_v20 }
  0x4c   : > { %2219 = vmatprep.mubr.msk.f32.mxu1 %vm273_vm0, %v263_v33  ;;  %2299 = vmatprep.mubr.msk.f32.mxu0 %vm273_vm0, %v637_v21 }
  0x4f   : > { %2220 = vmatmul.mubr.msk.f32.gmra.mrb[24].mxu1 %vm273_vm0, %v264_v34  ;;  %2300 = vmatmul.mubr.msk.f32.gmra.mrb[8].mxu0 %vm273_vm0, %v638_v22 }
  0x50   : > { %2222 = vmatprep.mubr.msk.f32.mxu1 %vm273_vm0, %v265_v35  ;;  %2302 = vmatprep.mubr.msk.f32.mxu0 %vm273_vm0, %v639_v23 }
  0x53   : > { %2223 = vmatmul.mubr.msk.f32.gmra.mrb[26].mxu1 %vm273_vm0, %v266_v36  ;;  %2303 = vmatmul.mubr.msk.f32.gmra.mrb[10].mxu0 %vm273_vm0, %v640_v24 }
  0x54   : > { %2225 = vmatprep.mubr.msk.f32.mxu1 %vm273_vm0, %v267_v37  ;;  %2305 = vmatprep.mubr.msk.f32.mxu0 %vm273_vm0, %v641_v25 }
  0x57   : > { %2226 = vmatmul.mubr.msk.f32.gmra.mrb[28].mxu1 %vm273_vm0, %v268_v38  ;;  %2306 = vmatmul.mubr.msk.f32.gmra.mrb[12].mxu0 %vm273_vm0, %v642_v26 }
  0x58   : > { %2228 = vmatprep.mubr.msk.f32.mxu1 %vm273_vm0, %v269_v39  ;;  %2308 = vmatprep.mubr.msk.f32.mxu0 %vm273_vm0, %v257_v27 }
  0x5b   : > { %2229 = vmatmul.mubr.msk.f32.gmra.mrb[30].mxu1 %vm273_vm0, %v270_v40  ;;  %2309 = vmatmul.mubr.msk.f32.gmra.mrb[14].mxu0 %vm273_vm0, %v258_v28 }
  0x5c   : > { %2259 = vmatprep.mubr.msk.f32.mxu1 %vm273_vm0, %v257_v27  ;;  %2311 = vmatprep.mubr.msk.f32.mxu0 %vm273_vm0, %v259_v29 }
  0x5f   : > { %2260 = vmatmul.mubr.msk.f32.vlgmr.msra.gmra.mrb[16].mxu1 %vm273_vm0, %v258_v28  ;;  %2312 = vmatmul.mubr.msk.f32.gmra.mrb[16].mxu0 %vm273_vm0, %v260_v30 }
  0x60   : > { %2262 = vmatprep.mubr.msk.f32.mxu1 %vm273_vm0, %v259_v29  ;;  %2314 = vmatprep.mubr.msk.f32.mxu0 %vm273_vm0, %v261_v31 }
  0x63   : > { %2263 = vmatmul.mubr.msk.f32.gmra.mrb[18].mxu1 %vm273_vm0, %v260_v30  ;;  %2315 = vmatmul.mubr.msk.f32.gmra.mrb[18].mxu0 %vm273_vm0, %v262_v32 }
  0x64   : > { %2265 = vmatprep.mubr.msk.f32.mxu1 %vm273_vm0, %v261_v31  ;;  %2317 = vmatprep.mubr.msk.f32.mxu0 %vm273_vm0, %v263_v33 }
  0x67   : > { %2266 = vmatmul.mubr.msk.f32.gmra.mrb[20].mxu1 %vm273_vm0, %v262_v32  ;;  %2318 = vmatmul.mubr.msk.f32.gmra.mrb[20].mxu0 %vm273_vm0, %v264_v34 }
  0x68   : > { %2268 = vmatprep.mubr.msk.f32.mxu1 %vm273_vm0, %v263_v33  ;;  %2320 = vmatprep.mubr.msk.f32.mxu0 %vm273_vm0, %v265_v35 }
  0x6b   : > { %2269 = vmatmul.mubr.msk.f32.gmra.mrb[22].mxu1 %vm273_vm0, %v264_v34  ;;  %2321 = vmatmul.mubr.msk.f32.gmra.mrb[22].mxu0 %vm273_vm0, %v266_v36 }
  0x6c   : > { %2271 = vmatprep.mubr.msk.f32.mxu1 %vm273_vm0, %v265_v35  ;;  %2323 = vmatprep.mubr.msk.f32.mxu0 %vm273_vm0, %v267_v37 }
  0x6f   : > { %2272 = vmatmul.mubr.msk.f32.gmra.mrb[24].mxu1 %vm273_vm0, %v266_v36  ;;  %2324 = vmatmul.mubr.msk.f32.gmra.mrb[24].mxu0 %vm273_vm0, %v268_v38 }
  0x70   : > { %2274 = vmatprep.mubr.msk.f32.mxu1 %vm273_vm0, %v267_v37  ;;  %2326 = vmatprep.mubr.msk.f32.mxu0 %vm273_vm0, %v269_v39 }
  0x73   : > { %2275 = vmatmul.mubr.msk.f32.gmra.mrb[26].mxu1 %vm273_vm0, %v268_v38  ;;  %2327 = vmatmul.mubr.msk.f32.gmra.mrb[26].mxu0 %vm273_vm0, %v270_v40 }
  0x74   : > { %2277 = vmatprep.mubr.msk.f32.mxu1 %vm273_vm0, %v269_v39  ;;  %2329 = vmatprep.mubr.msk.f32.mxu0 %vm273_vm0, %v1107_v41 }
  0x77   : > { %2278 = vmatmul.mubr.msk.f32.gmra.mrb[28].mxu1 %vm273_vm0, %v270_v40  ;;  %2330 = vmatmul.mubr.msk.f32.gmra.mrb[28].mxu0 %vm273_vm0, %v1108_v42 }
  0x78   : > { %2280 = vmatprep.mubr.msk.f32.mxu1 %vm273_vm0, %v1107_v41  ;;  %2332 = vmatprep.mubr.msk.f32.mxu0 %vm273_vm0, %v1109_v43 }
  0x7b   : > { %2281 = vmatmul.mubr.msk.f32.gmra.mrb[30].mxu1 %vm273_vm0, %v1108_v42  ;;  %2333 = vmatmul.mubr.msk.f32.gmra.mrb[30].mxu0 %vm273_vm0, %v1110_v44 }
  0xf2   : > { %v2185_v45 = vpop.f32.mrb[0].mxu1 }
  0xf3   : > { %v436_v46 = vpop.f32.mrb[1].mxu1 }
  0xf6   : > { %v2188_v47 = vpop.f32.mrb[2].mxu1 }
  0xf7   : > { %v446_v48 = vpop.f32.mrb[3].mxu1 }
  0xfa   : > { %v2191_v49 = vpop.f32.mrb[4].mxu1 }
  0xfb   : > { %v456_v50 = vpop.f32.mrb[5].mxu1 }
  0xfe   : > { %v2194_v51 = vpop.f32.mrb[6].mxu1 }
  0xff   : > { %v466_v52 = vpop.f32.mrb[7].mxu1 }
 0x102   : > { %v2197_v53 = vpop.f32.mrb[8].mxu1 }
 0x103   : > { %v476_v54 = vpop.f32.mrb[9].mxu1 }
 0x106   : > { %v2824_v55 = vpop.f32.mrb[10].mxu1 }
 0x107   : > { %v2826_v56 = vpop.f32.mrb[11].mxu1 }
 0x10a   : > { %v2828_v57 = vpop.f32.mrb[12].mxu1 }
 0x10b   : > { %v2830_v58 = vpop.f32.mrb[13].mxu1 }
 0x10e   : > { %v2835_v59 = vpop.f32.mrb[14].mxu1 }
 0x10f   : > { %v2837_v60 = vpop.f32.mrb[15].mxu1 }
 0x112   : > { %v2289_v61 = vpop.f32.mrb[0].mxu0 }
 0x113   : > { %v2349_v62 = vadd.f32 %v2289_v61, %v2185_v45  ;;  %v1276_v63 = vpop.f32.mrb[1].mxu0 }
 0x114   : > { %v2350_v0 = vadd.f32 %v1276_v63, %v436_v46 }
 0x115   : > { %1564 = vst [vmem:[%s2840_s28 + $0x8] sm:$0xff] %v2349_v62  ;;  %v1716_v1 = vmul.f32 %v2349_v62, %v2349_v62 }
 0x116   : > { %1563 = vst [vmem:[%s2840_s28] sm:$0xff] %v2350_v0  ;;  %v1678_v2 = vadd.f32 %v2350_v0, %v2349_v62  ;;  %v1715_v3 = vmul.f32 %v2350_v0, %v2350_v0  ;;  %v2292_v4 = vpop.f32.mrb[2].mxu0 }
 0x117   : > { %v2351_v5 = vadd.f32 %v2292_v4, %v2188_v47  ;;  %v1286_v6 = vpop.f32.mrb[3].mxu0 }
 0x118   : > { %v1747_v7 = vadd.f32 %v1716_v1, %v1715_v3  ;;  %v2352_v8 = vadd.f32 %v1286_v6, %v446_v48 }
 0x119   : > { %1566 = vst [vmem:[%s2840_s28 + $0x18] sm:$0xff] %v2351_v5  ;;  %v1718_v14 = vmul.f32 %v2351_v5, %v2351_v5 }
 0x11a   : > { %1565 = vst [vmem:[%s2840_s28 + $0x10] sm:$0xff] %v2352_v8  ;;  %v1679_v9 = vadd.f32 %v2352_v8, %v1678_v2  ;;  %v1717_v10 = vmul.f32 %v2352_v8, %v2352_v8  ;;  %v2295_v11 = vpop.f32.mrb[4].mxu0 }
 0x11b   : > { %v2353_v12 = vadd.f32 %v2295_v11, %v2191_v49  ;;  %v1296_v13 = vpop.f32.mrb[5].mxu0 }
 0x11c   : > { %v1748_v15 = vadd.f32 %v1747_v7, %v1717_v10  ;;  %v2354_v16 = vadd.f32 %v1296_v13, %v456_v50  ;;  %v1680_v17 = vadd.f32 %v2351_v5, %v1679_v9 }
 0x11d   : > { %1568 = vst [vmem:[%s2840_s28 + $0x28] sm:$0xff] %v2353_v12  ;;  %v1720_v24 = vmul.f32 %v2353_v12, %v2353_v12 }
 0x11e   : > { %1567 = vst [vmem:[%s2840_s28 + $0x20] sm:$0xff] %v2354_v16  ;;  %v1681_v18 = vadd.f32 %v2354_v16, %v1680_v17  ;;  %v1719_v19 = vmul.f32 %v2354_v16, %v2354_v16  ;;  %v1749_v20 = vadd.f32 %v1748_v15, %v1718_v14  ;;  %v2298_v21 = vpop.f32.mrb[6].mxu0 }
 0x11f   : > { %v2355_v22 = vadd.f32 %v2298_v21, %v2194_v51  ;;  %v1306_v23 = vpop.f32.mrb[7].mxu0 }
 0x120   : > { %v1750_v25 = vadd.f32 %v1749_v20, %v1719_v19  ;;  %v2356_v26 = vadd.f32 %v1306_v23, %v466_v52  ;;  %v1682_v27 = vadd.f32 %v2353_v12, %v1681_v18 }
 0x121   : > { %1570 = vst [vmem:[%s2840_s28 + $0x38] sm:$0xff] %v2355_v22  ;;  %v1722_v34 = vmul.f32 %v2355_v22, %v2355_v22 }
 0x122   : > { %1569 = vst [vmem:[%s2840_s28 + $0x30] sm:$0xff] %v2356_v26  ;;  %v1683_v28 = vadd.f32 %v2356_v26, %v1682_v27  ;;  %v1721_v29 = vmul.f32 %v2356_v26, %v2356_v26  ;;  %v1751_v30 = vadd.f32 %v1750_v25, %v1720_v24  ;;  %v2301_v31 = vpop.f32.mrb[8].mxu0 }
 0x123   : > { %v2357_v32 = vadd.f32 %v2301_v31, %v2197_v53  ;;  %v1316_v33 = vpop.f32.mrb[9].mxu0 }
 0x124   : > { %v1752_v35 = vadd.f32 %v1751_v30, %v1721_v29  ;;  %v2358_v36 = vadd.f32 %v1316_v33, %v476_v54  ;;  %v1684_v37 = vadd.f32 %v2355_v22, %v1683_v28 }
 0x125   : > { %1572 = vst [vmem:[%s2840_s28 + $0x48] sm:$0xff] %v2357_v32  ;;  %v1724_v44 = vmul.f32 %v2357_v32, %v2357_v32 }
 0x126   : > { %1571 = vst [vmem:[%s2840_s28 + $0x40] sm:$0xff] %v2358_v36  ;;  %v1685_v38 = vadd.f32 %v2358_v36, %v1684_v37  ;;  %v1723_v39 = vmul.f32 %v2358_v36, %v2358_v36  ;;  %v1753_v40 = vadd.f32 %v1752_v35, %v1722_v34  ;;  %v2304_v41 = vpop.f32.mrb[10].mxu0 }
 0x127   : > { %v2359_v42 = vadd.f32 %v2304_v41, %v2824_v55  ;;  %v1326_v43 = vpop.f32.mrb[11].mxu0 }
 0x128   : > { %v1754_v45 = vadd.f32 %v1753_v40, %v1723_v39  ;;  %v2360_v46 = vadd.f32 %v1326_v43, %v2826_v56  ;;  %v1686_v47 = vadd.f32 %v2357_v32, %v1685_v38 }
 0x129   : > { %1574 = vst [vmem:[%s2840_s28 + $0x58] sm:$0xff] %v2359_v42  ;;  %v1726_v54 = vmul.f32 %v2359_v42, %v2359_v42 }
 0x12a   : > { %1573 = vst [vmem:[%s2840_s28 + $0x50] sm:$0xff] %v2360_v46  ;;  %v1687_v48 = vadd.f32 %v2360_v46, %v1686_v47  ;;  %v1725_v49 = vmul.f32 %v2360_v46, %v2360_v46  ;;  %v1755_v50 = vadd.f32 %v1754_v45, %v1724_v44  ;;  %v2307_v51 = vpop.f32.mrb[12].mxu0 }
 0x12b   : > { %v2361_v52 = vadd.f32 %v2307_v51, %v2828_v57  ;;  %v1336_v53 = vpop.f32.mrb[13].mxu0 }
 0x12c   : > { %v1756_v55 = vadd.f32 %v1755_v50, %v1725_v49  ;;  %v2362_v61 = vadd.f32 %v1336_v53, %v2830_v58  ;;  %v1688_v62 = vadd.f32 %v2359_v42, %v1687_v48 }
 0x12d   : > { %1576 = vst [vmem:[%s2840_s28 + $0x68] sm:$0xff] %v2361_v52  ;;  %v1728_v4 = vmul.f32 %v2361_v52, %v2361_v52 }
 0x12e   : > { %1575 = vst [vmem:[%s2840_s28 + $0x60] sm:$0xff] %v2362_v61  ;;  %v1689_v56 = vadd.f32 %v2362_v61, %v1688_v62  ;;  %v1727_v63 = vmul.f32 %v2362_v61, %v2362_v61  ;;  %v1757_v0 = vadd.f32 %v1756_v55, %v1726_v54  ;;  %v2310_v1 = vpop.f32.mrb[14].mxu0 }
 0x12f   : > { %v2363_v2 = vadd.f32 %v2310_v1, %v2835_v59  ;;  %v1346_v3 = vpop.f32.mrb[15].mxu0 }
 0x130   : > { %v1758_v5 = vadd.f32 %v1757_v0, %v1727_v63  ;;  %v2364_v57 = vadd.f32 %v1346_v3, %v2837_v60  ;;  %v1690_v6 = vadd.f32 %v2361_v52, %v1689_v56 }
 0x131   : > { %1578 = vst [vmem:[%s2840_s28 + $0x78] sm:$0xff] %v2363_v2  ;;  %v1730_v14 = vmul.f32 %v2363_v2, %v2363_v2 }
 0x132   : > { %1577 = vst [vmem:[%s2840_s28 + $0x70] sm:$0xff] %v2364_v57  ;;  %v1691_v58 = vadd.f32 %v2364_v57, %v1690_v6  ;;  %v1729_v7 = vmul.f32 %v2364_v57, %v2364_v57  ;;  %v1759_v8 = vadd.f32 %v1758_v5, %v1728_v4  ;;  %v2261_v9 = vpop.f32.mrb[16].mxu1  ;;  %v2313_v10 = vpop.f32.mrb[16].mxu0 }
 0x133   : > { %v2365_v11 = vadd.f32 %v2313_v10, %v2261_v9  ;;  %v904_v12 = vpop.f32.mrb[17].mxu1  ;;  %v1356_v13 = vpop.f32.mrb[17].mxu0 }
 0x134   : > { %v1760_v59 = vadd.f32 %v1759_v8, %v1729_v7  ;;  %v2366_v15 = vadd.f32 %v1356_v13, %v904_v12  ;;  %v1692_v16 = vadd.f32 %v2363_v2, %v1691_v58 }
 0x135   : > { %1580 = vst [vmem:[%s2840_s28 + $0x88] sm:$0xff] %v2365_v11  ;;  %v1732_v24 = vmul.f32 %v2365_v11, %v2365_v11 }
 0x136   : > { %1579 = vst [vmem:[%s2840_s28 + $0x80] sm:$0xff] %v2366_v15  ;;  %v1693_v60 = vadd.f32 %v2366_v15, %v1692_v16  ;;  %v1731_v17 = vmul.f32 %v2366_v15, %v2366_v15  ;;  %v1761_v18 = vadd.f32 %v1760_v59, %v1730_v14  ;;  %v2264_v19 = vpop.f32.mrb[18].mxu1  ;;  %v2316_v20 = vpop.f32.mrb[18].mxu0 }
 0x137   : > { %v2367_v21 = vadd.f32 %v2316_v20, %v2264_v19  ;;  %v914_v22 = vpop.f32.mrb[19].mxu1  ;;  %v1366_v23 = vpop.f32.mrb[19].mxu0 }
 0x138   : > { %v1762_v25 = vadd.f32 %v1761_v18, %v1731_v17  ;;  %v2368_v26 = vadd.f32 %v1366_v23, %v914_v22  ;;  %v1694_v27 = vadd.f32 %v2365_v11, %v1693_v60 }
 0x139   : > { %1582 = vst [vmem:[%s2840_s28 + $0x98] sm:$0xff] %v2367_v21  ;;  %v1734_v36 = vmul.f32 %v2367_v21, %v2367_v21 }
 0x13a   : > { %1581 = vst [vmem:[%s2840_s28 + $0x90] sm:$0xff] %v2368_v26  ;;  %v1695_v28 = vadd.f32 %v2368_v26, %v1694_v27  ;;  %v1733_v29 = vmul.f32 %v2368_v26, %v2368_v26  ;;  %v1763_v30 = vadd.f32 %v1762_v25, %v1732_v24  ;;  %v2267_v31 = vpop.f32.mrb[20].mxu1  ;;  %v2319_v32 = vpop.f32.mrb[20].mxu0 }
 0x13b   : > { %v2369_v33 = vadd.f32 %v2319_v32, %v2267_v31  ;;  %v924_v34 = vpop.f32.mrb[21].mxu1  ;;  %v1376_v35 = vpop.f32.mrb[21].mxu0 }
 0x13c   : > { %v1764_v37 = vadd.f32 %v1763_v30, %v1733_v29  ;;  %v2370_v38 = vadd.f32 %v1376_v35, %v924_v34  ;;  %v1696_v39 = vadd.f32 %v2367_v21, %v1695_v28 }
 0x13d   : > { %1584 = vst [vmem:[%s2840_s28 + $0xa8] sm:$0xff] %v2369_v33  ;;  %v1736_v48 = vmul.f32 %v2369_v33, %v2369_v33 }
 0x13e   : > { %1583 = vst [vmem:[%s2840_s28 + $0xa0] sm:$0xff] %v2370_v38  ;;  %v1697_v40 = vadd.f32 %v2370_v38, %v1696_v39  ;;  %v1735_v41 = vmul.f32 %v2370_v38, %v2370_v38  ;;  %v1765_v42 = vadd.f32 %v1764_v37, %v1734_v36  ;;  %v2270_v43 = vpop.f32.mrb[22].mxu1  ;;  %v2322_v44 = vpop.f32.mrb[22].mxu0 }
 0x13f   : > { %v2371_v45 = vadd.f32 %v2322_v44, %v2270_v43  ;;  %v934_v46 = vpop.f32.mrb[23].mxu1  ;;  %v1386_v47 = vpop.f32.mrb[23].mxu0 }
 0x140   : > { %v1766_v49 = vadd.f32 %v1765_v42, %v1735_v41  ;;  %v2372_v50 = vadd.f32 %v1386_v47, %v934_v46  ;;  %v1698_v51 = vadd.f32 %v2369_v33, %v1697_v40 }
 0x141   : > { %1586 = vst [vmem:[%s2840_s28 + $0xb8] sm:$0xff] %v2371_v45  ;;  %v1738_v0 = vmul.f32 %v2371_v45, %v2371_v45 }
 0x142   : > { %1585 = vst [vmem:[%s2840_s28 + $0xb0] sm:$0xff] %v2372_v50  ;;  %v1699_v52 = vadd.f32 %v2372_v50, %v1698_v51  ;;  %v1737_v53 = vmul.f32 %v2372_v50, %v2372_v50  ;;  %v1767_v54 = vadd.f32 %v1766_v49, %v1736_v48  ;;  %v2273_v55 = vpop.f32.mrb[24].mxu1  ;;  %v2325_v61 = vpop.f32.mrb[24].mxu0 }
 0x143   : > { %v2373_v62 = vadd.f32 %v2325_v61, %v2273_v55  ;;  %v944_v56 = vpop.f32.mrb[25].mxu1  ;;  %v1396_v63 = vpop.f32.mrb[25].mxu0 }
 0x144   : > { %v1768_v1 = vadd.f32 %v1767_v54, %v1737_v53  ;;  %v2374_v2 = vadd.f32 %v1396_v63, %v944_v56  ;;  %v1700_v3 = vadd.f32 %v2371_v45, %v1699_v52 }
 0x145   : > { %1588 = vst [vmem:[%s2840_s28 + $0xc8] sm:$0xff] %v2373_v62  ;;  %v1740_v10 = vmul.f32 %v2373_v62, %v2373_v62 }
 0x146   : > { %1587 = vst [vmem:[%s2840_s28 + $0xc0] sm:$0xff] %v2374_v2  ;;  %v1701_v4 = vadd.f32 %v2374_v2, %v1700_v3  ;;  %v1739_v5 = vmul.f32 %v2374_v2, %v2374_v2  ;;  %v1769_v57 = vadd.f32 %v1768_v1, %v1738_v0  ;;  %v2276_v6 = vpop.f32.mrb[26].mxu1  ;;  %v2328_v58 = vpop.f32.mrb[26].mxu0 }
 0x147   : > { %v2375_v7 = vadd.f32 %v2328_v58, %v2276_v6  ;;  %v954_v8 = vpop.f32.mrb[27].mxu1  ;;  %v1406_v9 = vpop.f32.mrb[27].mxu0 }
 0x148   : > { %v1770_v11 = vadd.f32 %v1769_v57, %v1739_v5  ;;  %v2376_v12 = vadd.f32 %v1406_v9, %v954_v8  ;;  %v1702_v13 = vadd.f32 %v2373_v62, %v1701_v4 }
 0x149   : > { %1590 = vst [vmem:[%s2840_s28 + $0xd8] sm:$0xff] %v2375_v7  ;;  %v1742_v20 = vmul.f32 %v2375_v7, %v2375_v7 }
 0x14a   : > { %1589 = vst [vmem:[%s2840_s28 + $0xd0] sm:$0xff] %v2376_v12  ;;  %v1703_v14 = vadd.f32 %v2376_v12, %v1702_v13  ;;  %v1741_v59 = vmul.f32 %v2376_v12, %v2376_v12  ;;  %v1771_v15 = vadd.f32 %v1770_v11, %v1740_v10  ;;  %v2279_v16 = vpop.f32.mrb[28].mxu1  ;;  %v2331_v60 = vpop.f32.mrb[28].mxu0 }
 0x14b   : > { %v2377_v17 = vadd.f32 %v2331_v60, %v2279_v16  ;;  %v964_v18 = vpop.f32.mrb[29].mxu1  ;;  %v1416_v19 = vpop.f32.mrb[29].mxu0 }
 0x14c   : > { %v1772_v21 = vadd.f32 %v1771_v15, %v1741_v59  ;;  %v2378_v22 = vadd.f32 %v1416_v19, %v964_v18  ;;  %v1704_v23 = vadd.f32 %v2375_v7, %v1703_v14 }
 0x14d   : > { %1592 = vst [vmem:[%s2840_s28 + $0xe8] sm:$0xff] %v2377_v17  ;;  %v1744_v32 = vmul.f32 %v2377_v17, %v2377_v17 }
 0x14e   : > { %1591 = vst [vmem:[%s2840_s28 + $0xe0] sm:$0xff] %v2378_v22  ;;  %v1705_v24 = vadd.f32 %v2378_v22, %v1704_v23  ;;  %v1743_v25 = vmul.f32 %v2378_v22, %v2378_v22  ;;  %v1773_v26 = vadd.f32 %v1772_v21, %v1742_v20  ;;  %v2282_v27 = vpop.f32.mrb[30].mxu1  ;;  %v2334_v28 = vpop.f32.mrb[30].mxu0 }
 0x14f   : > { %v2379_v29 = vadd.f32 %v2334_v28, %v2282_v27  ;;  %v974_v30 = vpop.f32.mrb[31].mxu1  ;;  %v1426_v31 = vpop.f32.mrb[31].mxu0 }
 0x150   : > { %v1774_v33 = vadd.f32 %v1773_v26, %v1743_v25  ;;  %v2380_v34 = vadd.f32 %v1426_v31, %v974_v30  ;;  %v1706_v35 = vadd.f32 %v2377_v17, %v1705_v24 }
 0x151   : > { %1594 = vst [vmem:[%s2840_s28 + $0xf8] sm:$0xff] %v2379_v29 }
 0x152   : > { %1593 = vst [vmem:[%s2840_s28 + $0xf0] sm:$0xff] %v2380_v34  ;;  %v1707_v36 = vadd.f32 %v2380_v34, %v1706_v35  ;;  %v1745_v37 = vmul.f32 %v2380_v34, %v2380_v34  ;;  %v1775_v38 = vadd.f32 %v1774_v33, %v1744_v32 }
 0x153   : > { %2489 = shalt.err (!%p2486_p5)
}
 0x154   : > { %s2490_s18 = scalar_lea.hbm %s2883_s6, 4096  ;;  %s2494_s23 = scalar_lea.hbm %s2968_s2, 8192 }
 0x155   : > { %p2491_p6 = scmp.ne.s32.totalorder %s2883_s6, %s2490_s18  ;;  %p2495_p10 = scmp.lt.u32.totalorder %s2883_s6, %s2968_s2 }
 0x156   : > { %p2496_p11 = scmp.lt.u32.totalorder %s2494_s23, %s2490_s18  ;;  %p2498_p13 = scmp.lt.u32.totalorder %s2490_s18, %s2883_s6 }
 0x157   : > { %p2492_p7 = pnand %p2491_p6, %p2652_p4 }
 0x158   : > { %p2497_p12 = por %p2496_p11, %p2495_p10 }
 0x159   : > { %p2493_p9 = pneg %p2492_p7 }
 0x15a   : > { %p2499_p0 = por %p2498_p13, %p2497_p12 }
 0x15c   : > { %p2500_p1 = pnand %p2499_p0, %p2493_p9 }
 0x15e   : > { %2503 = shalt.err (!%p2500_p1)
}
 0x15f   : > { %s2589_s29 = smov 128   ;;  %s2590_s4 = smov 8   ;;  %v1746_v39 = vmul.f32 %v2379_v29, %v2379_v29  ;;  %v1708_v40 = vadd.f32 %v2379_v29, %v1707_v36  ;;  %v1776_v41 = vadd.f32 %v1775_v38, %v1745_v37  ;;  %vm1784_vm1 = vcmask 1040384  }
 0x160   : > { %2414 = dma.vmem_to_hbm [thread:$0]  (%p2652_p4), %s2885_s30, 4096, %s2883_s6, %s1788_s7, %s2589_s29, %s2589_s29, %s2590_s4  }
 0x161   : > { %v1709_v42 = vrot.slane %v1708_v40, 4  ;;  %v1777_v43 = vadd.f32 %v1776_v41, %v1746_v39  ;;  %s1967_s5 = sshll.u32 %s2833_s26, 1  ;;  %s2073_s8 = sshll.u32 %s2578_s15, 5 }
 0x162   : > { %s224_s30 = scalar_lea.vmem [#allocation5], %s1967_s5  ;;  %s2918_s10 = scalar_lea.hbm %s2969_s3, %s2073_s8 }
 0x163   : > { %v1710_v44 = vadd.f32 %v1709_v42, %v1708_v40  ;;  %v1778_v45 = vrot.slane %v1777_v43, 4  ;;  %s1828_s6 = sshll.u32 %s224_s30, 4  ;;  %s1793_s11 = scalar_lea.sflag [#allocation6], %s2833_s26  ;;  %s2920_s6 = int_to_ptr.vmem [resolvable:$true] %s1828_s6 }
 0x164   : > { %s2504_s18 = scalar_lea.vmem %s2920_s6, 32  ;;  %s2591_s15 = smov [#allocation5]  }
 0x165   : > { %v1711_v46 = vrot.slane %v1710_v44, 2  ;;  %v1779_v47 = vadd.f32 %v1778_v45, %v1777_v43  ;;  %p2505_p2 = scmp.ne.s32.totalorder %s2920_s6, %s2504_s18  ;;  %s2508_s19 = sshll.u32 %s2591_s15, 4  ;;  %s2509_s19 = int_to_ptr.vmem [resolvable:$false] %s2508_s19 }
 0x166   : > { %s2510_s21 = scalar_lea.vmem %s2509_s19, 64  ;;  %p2511_p6 = scmp.lt.s32.totalorder %s2920_s6, %s2509_s19 }
 0x167   : > { %v1712_v48 = vadd.f32 %v1711_v46, %v1710_v44  ;;  %v1780_v49 = vrot.slane %v1779_v47, 2  ;;  %p2506_p3 = pnand %p2505_p2, %p2652_p4  ;;  %p2512_p7 = scmp.lt.s32.totalorder %s2510_s21, %s2504_s18 }
 0x169   : > { %v1713_v50 = vrot.slane %v1712_v48, 1  ;;  %v1781_v51 = vadd.f32 %v1780_v49, %v1779_v47  ;;  %p2507_p5 = pneg %p2506_p3  ;;  %p2513_p9 = por %p2512_p7, %p2511_p6 }
 0x16b   : > { %v1782_v52 = vrot.slane %v1781_v51, 1  ;;  %v1714_v53 = vadd.f32 %v1713_v50, %v1712_v48  ;;  %p2514_p10 = pnand %p2513_p9, %p2507_p5 }
 0x16d   : > { %v1783_v54 = vadd.f32 %v1782_v52, %v1781_v51 }
 0x16f   : > { %v1785_v55 = vsel %vm1784_vm1, %v1714_v53, %v1783_v54 }
 0x170   : > { %1786 = vst [vmem:[%s224_s30] sm:$0x3] %v1785_v55 }
 0x171   : > { %2517 = shalt.err (!%p2514_p10)
}
 0x172   : > { %s2518_s26 = scalar_lea.hbm %s2918_s10, 32  ;;  %s2522_s28 = scalar_lea.hbm %s2969_s3, 64 }
 0x173   : > { %p2519_p11 = scmp.ne.s32.totalorder %s2918_s10, %s2518_s26  ;;  %p2523_p0 = scmp.lt.u32.totalorder %s2918_s10, %s2969_s3 }
 0x174   : > { %p2524_p1 = scmp.lt.u32.totalorder %s2522_s28, %s2518_s26  ;;  %p2526_p3 = scmp.lt.u32.totalorder %s2518_s26, %s2918_s10 }
 0x175   : > { %p2520_p12 = pnand %p2519_p11, %p2652_p4 }
 0x176   : > { %p2525_p2 = por %p2524_p1, %p2523_p0 }
 0x177   : > { %p2521_p13 = pneg %p2520_p12 }
 0x178   : > { %p2527_p5 = por %p2526_p3, %p2525_p2 }
 0x17a   : > { %p2528_p6 = pnand %p2527_p5, %p2521_p13 }
 0x17c   : > { %2531 = shalt.err (!%p2528_p6)
}
 0x17d   : > { %2415 = dma.vmem_to_hbm [thread:$0]  (%p2652_p4), %s2920_s6, 32, %s2918_s10, %s1793_s11  }
 0x17e PF: > { %p2425_p7 = scmp.ge.s32.totalorder %s2586_s17, 2  ;;  %s1840_s5 = sand.u32 1, %s2566_s12  }
 0x17f   : > { %s1841_s8 = scalar_lea.sflag [#allocation4], %s1840_s5 }
 0x180   : > { %p2419_p9 = pnand %p2425_p7, %p2659_p8 }
 0x182   : > { %2557 = dma.done.wait (!%p2419_p9), %s1841_s8, 4096  }
 0x183   : > { %2559 = vsyncadd (!%p2419_p9), %s1841_s8, 4294963200  ;;  %s1850_s30 = scalar_lea.sflag [#allocation6], %s1840_s5 }
 0x184   : > { %2561 = dma.done.wait (!%p2419_p9), %s1850_s30, 32  }
 0x185   : > { %2563 = vsyncadd (!%p2419_p9), %s1850_s30, 4294967264  ;;  %s20_s17 = sadd.s32 1, %s2586_s17   ;;  %s2972_s12 = smov %s2570_s13 }
 0x186   : > { %p17_p10 = scmp.ge.s32.totalorder %s20_s17, 4   ;;  %s2973_s13 = smov %s2574_s14 }
 0x187   : > { %s2974_s14 = smov %s2665_s25  ;;  %s2975_s15 = smov %s2582_s16 }
 0x188   : > { %s2976_s16 = smov %s2978_s20  ;;  %19 = sbr.rel (!%p17_p10) target bundleno = 6 (0x6), region = 85 }
 0x18f   :  { %1855 = vsyncpa [#allocation4], 1 }
 0x190   :  { %1857 = vsyncpa [#allocation4 + $0x1], 1 }
 0x191   :  { %1858 = vsyncpa [#allocation6], 1 }
 0x192   :  { %1860 = vsyncpa [#allocation6 + $0x1], 1 }

</bundles_post_ra>
